<compile_context>
chip_gen: v6e
topology: v6e:2x2x1
jax: 0.10.0
libtpu: 0.0.40
codegen_flags: <defaults>
</compile_context>

<pallas_src>
import functools

import jax
import jax.numpy as jnp
from jax import lax
from jax.experimental import pallas as pl
from jax.experimental.pallas import tpu as pltpu


_ACT_DTYPE = jnp.bfloat16   # activation dtype between kernels (halves HBM traffic)
_W_DTYPE = jnp.bfloat16     # weight storage dtype (MXU-native)


# ----------------------------------------------------------------------------
# Hardware-aware limits & feature probes
# ----------------------------------------------------------------------------
def _vmem_limit_bytes():
    cap = 64 * 1024 * 1024  # conservative default == v7x per-TensorCore VMEM
    try:
        c = int(getattr(pltpu.get_tpu_info(), "vmem_capacity_bytes", 0))
        if c >= 16 * 1024 * 1024:
            cap = c
    except Exception:
        pass
    return max(32 * 1024 * 1024, min(int(cap * 0.8), 110 * 1024 * 1024))


_VMEM_LIMIT = _vmem_limit_bytes()
# Single-discounted budget: the sizing math below already counts double-buffering
# per array explicitly, so the tile budget only keeps modest compiler headroom.
_TILE_BUDGET = int(_VMEM_LIMIT * 0.85)


def _probe_single_buffer():
    """Check whether pl.Buffered(1) (single-buffered constant blocks) is usable."""
    try:
        if jax.devices()[0].platform != "tpu":
            return False

        def k(a_ref, w_ref, o_ref):
            o_ref[...] = a_ref[...] + w_ref[...]

        y = pl.pallas_call(
            k,
            out_shape=jax.ShapeDtypeStruct((16, 128), jnp.float32),
            grid=(2,),
            in_specs=[
                pl.BlockSpec((8, 128), lambda i: (i, 0)),
                pl.BlockSpec((8, 128), lambda i: (0, 0),
                             pipeline_mode=pl.Buffered(1)),
            ],
            out_specs=pl.BlockSpec((8, 128), lambda i: (i, 0)),
        )(jnp.zeros((16, 128), jnp.float32), jnp.ones((8, 128), jnp.float32))
        jax.block_until_ready(y)
        return bool(jnp.all(y == 1.0))
    except Exception:
        return False


_SINGLE_BUF_OK = _probe_single_buffer()
_W_COPIES = 1 if _SINGLE_BUF_OK else 2


def _const_spec(shape):
    """BlockSpec for a block whose index never changes across the grid (weights etc.)."""
    idx = lambda *args: (0,) * len(shape)
    if _SINGLE_BUF_OK:
        return pl.BlockSpec(shape, idx, pipeline_mode=pl.Buffered(1))
    return pl.BlockSpec(shape, idx)


def _round_up(x, m):
    return ((x + m - 1) // m) * m


def _row_tile(M, per_row_bytes, fixed_bytes):
    """Largest row tile (mult of 8, <=1024) that DIVIDES the 8-rounded M and fits budget.

    Returning a divisor avoids the pad-to-tile HBM copy (review: padding added a full
    extra read+write pass for HBM-bound kernels).  Mp != M only if M % 8 != 0."""
    Mp = _round_up(max(M, 8), 8)
    best = 8
    t = 8
    lim = min(Mp, 1024)
    while t <= lim:
        if Mp % t == 0 and fixed_bytes + t * per_row_bytes <= _TILE_BUDGET:
            best = t
        t += 8
    return best, Mp


def _apply_act(y, act):
    if act == "relu":
        return jnp.maximum(y, 0.0)
    if act == "gelu":
        # TODO(synk): tanh approximation (torch nn.GELU default is exact erf).
        return jax.nn.gelu(y)
    return y


_COMPILER_PARAMS_1D = pltpu.CompilerParams(
    dimension_semantics=("parallel",),
    vmem_limit_bytes=_VMEM_LIMIT,
)
_COMPILER_PARAMS_CONV = pltpu.CompilerParams(
    # Row axis must stay "arbitrary": the slab prefetch assumes sequential row order.
    dimension_semantics=("parallel", "arbitrary"),
    vmem_limit_bytes=_VMEM_LIMIT,
)


# ----------------------------------------------------------------------------
# Kernel 1: fused row-tiled matmul  (A @ W) + shift [+ residual] -> act
#           (1x1 convs; im2col fallback for the 3 strided convs)
#           BN scale is already folded into W.
# ----------------------------------------------------------------------------
def _mm_kernel_factory(act, has_res):
    def kernel(*refs):
        if has_res:
            a_ref, w_ref, b_ref, r_ref, o_ref = refs
        else:
            a_ref, w_ref, b_ref, o_ref = refs
        y = jnp.dot(a_ref[...].astype(jnp.bfloat16), w_ref[...],
                    preferred_element_type=jnp.float32)
        y = y + b_ref[...]
        if has_res:
            y = y + r_ref[...].astype(jnp.float32)
        o_ref[...] = _apply_act(y, act).astype(o_ref.dtype)

    return kernel


@functools.partial(jax.jit, static_argnames=("act", "out_dtype"))
def _mm_fused(a, w, shift, residual, act, out_dtype):
    M, K = a.shape
    N = w.shape[1]
    has_res = residual is not None

    fixed = _W_COPIES * w.size * w.dtype.itemsize + 2 * N * 4
    per_row = 2 * K * a.dtype.itemsize + 2 * N * jnp.dtype(out_dtype).itemsize
    if has_res:
        per_row += 2 * N * residual.dtype.itemsize
    per_row += 2 * N * 4  # f32 epilogue temporaries
    tm, Mp = _row_tile(M, per_row, fixed)
    if Mp != M:  # only when M is not a multiple of 8 (never for this network)
        a = jnp.pad(a, ((0, Mp - M), (0, 0)))
        if has_res:
            residual = jnp.pad(residual, ((0, Mp - M), (0, 0)))

    in_specs = [
        pl.BlockSpec((tm, K), lambda i: (i, 0)),
        _const_spec((K, N)),
        _const_spec((1, N)),
    ]
    args = [a, w, shift]
    if has_res:
        in_specs.append(pl.BlockSpec((tm, N), lambda i: (i, 0)))
        args.append(residual)

    out = pl.pallas_call(
        _mm_kernel_factory(act, has_res),
        out_shape=jax.ShapeDtypeStruct((Mp, N), out_dtype),
        grid=(Mp // tm,),
        in_specs=in_specs,
        out_specs=pl.BlockSpec((tm, N), lambda i: (i, 0)),
        compiler_params=_COMPILER_PARAMS_1D,
    )(*args)
    return out[:M] if Mp != M else out


# ----------------------------------------------------------------------------
# Kernel 2: row-tiled direct 3x3 (stride-1) conv, fused shift + residual + act.
#           Padded image stays in HBM; halo'd row slabs are manually DMA'd into a
#           double-buffered VMEM scratch (next slab prefetched during compute).
#           kw taps combined per kernel row -> kh dots of K = kw*Cin on the MXU.
# ----------------------------------------------------------------------------
def _conv_direct_kernel_factory(kh, kw, act, has_res, tro, Wo, cin, cout):
    sh = tro + kh - 1  # slab rows (tile + halo)

    def kernel(*refs):
        if has_res:
            x_hbm, w_ref, b_ref, r_ref, o_ref, slab, sem = refs
        else:
            x_hbm, w_ref, b_ref, o_ref, slab, sem = refs
        n = pl.program_id(0)
        r = pl.program_id(1)
        nrow = pl.num_programs(1)
        slot = r % 2

        # Prime the first slab of this image (row axis runs sequentially per image).
        @pl.when(r == 0)
        def _():
            pltpu.make_async_copy(x_hbm.at[n, pl.ds(0, sh)],
                                  slab.at[0], sem.at[0]).start()

        # Wait for the current slab (primed above, or prefetched in the previous step).
        pltpu.make_async_copy(x_hbm.at[n, pl.ds(r * tro, sh)],
                              slab.at[slot], sem.at[slot]).wait()

        # Prefetch the next slab of the same image into the other buffer.
        @pl.when(r + 1 < nrow)
        def _():
            nslot = 1 - slot
            pltpu.make_async_copy(x_hbm.at[n, pl.ds((r + 1) * tro, sh)],
                                  slab.at[nslot], sem.at[nslot]).start()

        acc = jnp.zeros((tro * Wo, cout), jnp.float32)
        for i in range(kh):
            # Combine the kw taps of kernel row i into one K = kw*Cin matmul.
            parts = [slab[slot, i:i + tro, j:j + Wo, :] for j in range(kw)]
            win = jnp.concatenate(parts, axis=-1).reshape(tro * Wo, kw * cin)
            acc = acc + jnp.dot(win, w_ref[i], preferred_element_type=jnp.float32)

        y = acc + b_ref[...]
        y = y.reshape(1, tro, Wo, cout)
        if has_res:
            y = y + r_ref[...].astype(jnp.float32)
        # TODO(synk): for Cout=64 on v5e consider lane-dense staging before the store.
        o_ref[...] = _apply_act(y, act).astype(o_ref.dtype)

    return kernel


@functools.partial(jax.jit, static_argnames=("kh", "kw", "act", "tro"))
def _conv_direct_impl(xpad, wk, shift, residual, *, kh, kw, act, tro):
    N, Hp, Wp, Cin = xpad.shape
    Ho, Wo = Hp - kh + 1, Wp - kw + 1
    Cout = wk.shape[2]
    has_res = residual is not None
    sh = tro + kh - 1
    assert Ho % tro == 0
    nrow = Ho // tro

    in_specs = [
        pl.BlockSpec(memory_space=pl.ANY),               # padded image stays in HBM
        _const_spec((kh, kw * Cin, Cout)),
        _const_spec((1, Cout)),
    ]
    args = [xpad, wk, shift]
    if has_res:
        in_specs.append(pl.BlockSpec((1, tro, Wo, Cout), lambda n, r: (n, r, 0, 0)))
        args.append(residual)

    return pl.pallas_call(
        _conv_direct_kernel_factory(kh, kw, act, has_res, tro, Wo, Cin, Cout),
        out_shape=jax.ShapeDtypeStruct((N, Ho, Wo, Cout), _ACT_DTYPE),
        grid=(N, nrow),
        in_specs=in_specs,
        out_specs=pl.BlockSpec((1, tro, Wo, Cout), lambda n, r: (n, r, 0, 0)),
        scratch_shapes=[
            pltpu.VMEM((2, sh, Wp, Cin), _ACT_DTYPE),     # double-buffered halo slab
            pltpu.SemaphoreType.DMA((2,)),
        ],
        compiler_params=_COMPILER_PARAMS_CONV,
    )(*args)


def _choose_conv_tile(Ho, Wo, Wp, Cin, Cout, kh, kw, has_res):
    """Largest row tile (divisor of Ho) whose pipeline fits the VMEM budget."""
    for t in range(Ho, 0, -1):
        if Ho % t:
            continue
        if t * Wo > 8192 and t > 1:      # keep the f32 accumulator moderate
            continue
        sh = t + kh - 1
        need = 2 * sh * Wp * Cin * 2                      # slab double buffer (bf16)
        need += _W_COPIES * kh * kw * Cin * Cout * 2      # weights (bf16)
        need += 2 * t * Wo * Cout * 2                     # output blocks
        if has_res:
            need += 2 * t * Wo * Cout * 2                 # residual blocks
        need += 2 * t * Wo * Cout * 4                     # f32 accumulator + epilogue
        need += 2 * t * Wo * kw * Cin * 2                 # window staging (bf16)
        if need <= _TILE_BUDGET:
            return t
    return None


# ----------------------------------------------------------------------------
# Kernel 3: fused DiffFusion  relu(x1@W0 + x2@W1 + |x1-x2|@W2 + shift)
# ----------------------------------------------------------------------------
def _diff_kernel(x1_ref, x2_ref, w_ref, b_ref, o_ref):
    a = x1_ref[...].astype(jnp.bfloat16)
    b = x2_ref[...].astype(jnp.bfloat16)
    d = jnp.abs(a - b)                               # bf16 absdiff (no f32 upcast)
    y = jnp.dot(a, w_ref[0], preferred_element_type=jnp.float32)
    y = y + jnp.dot(b, w_ref[1], preferred_element_type=jnp.float32)
    y = y + jnp.dot(d, w_ref[2], preferred_element_type=jnp.float32)
    y = y + b_ref[...]
    o_ref[...] = jnp.maximum(y, 0.0).astype(o_ref.dtype)


@jax.jit
def _diff_fusion_impl(x1, x2, w3, shift):
    M, C = x1.shape
    fixed = _W_COPIES * w3.size * 2 + 2 * C * 4
    per_row = 2 * 2 * C * 2 + 2 * C * 2 + C * 2 + 2 * C * 4
    tm, Mp = _row_tile(M, per_row, fixed)
    if Mp != M:
        x1 = jnp.pad(x1, ((0, Mp - M), (0, 0)))
        x2 = jnp.pad(x2, ((0, Mp - M), (0, 0)))
    row = pl.BlockSpec((tm, C), lambda i: (i, 0))
    out = pl.pallas_call(
        _diff_kernel,
        out_shape=jax.ShapeDtypeStruct((Mp, C), _ACT_DTYPE),
        grid=(Mp // tm,),
        in_specs=[row, row, _const_spec((3, C, C)), _const_spec((1, C))],
        out_specs=row,
        compiler_params=_COMPILER_PARAMS_1D,
    )(x1, x2, w3, shift)
    return out[:M] if Mp != M else out


# ----------------------------------------------------------------------------
# Kernel 4: fused CSWin stand-in block  LN -> fc1(+GELU) -> fc2 -> + residual
# ----------------------------------------------------------------------------
def _cswin_block_kernel(t_ref, g_ref, b_ref, w1_ref, c1_ref, w2_ref, c2_ref, o_ref):
    x = t_ref[...].astype(jnp.float32)
    mu = jnp.mean(x, axis=-1, keepdims=True)
    xc = x - mu
    var = jnp.mean(xc * xc, axis=-1, keepdims=True)
    y = xc * lax.rsqrt(var + 1e-5) * g_ref[...] + b_ref[...]
    h = jnp.dot(y.astype(jnp.bfloat16), w1_ref[...],
                preferred_element_type=jnp.float32)
    h = _apply_act(h + c1_ref[...], "gelu")
    z = jnp.dot(h.astype(jnp.bfloat16), w2_ref[...],
                preferred_element_type=jnp.float32)
    o_ref[...] = (z + c2_ref[...] + x).astype(o_ref.dtype)


@jax.jit
def _cswin_block_impl(t, g, b, w1, c1, w2, c2):
    M, D = t.shape
    fixed = _W_COPIES * (w1.size + w2.size) * 2 + 8 * D * 4
    # tighter per-row estimate: in/out bf16 blocks + ~6 live f32 temps + bf16 casts
    per_row = 2 * (2 * D * 2) + 6 * D * 4 + 2 * D * 2
    tm, Mp = _row_tile(M, per_row, fixed)
    tp = jnp.pad(t, ((0, Mp - M), (0, 0))) if Mp != M else t
    out = pl.pallas_call(
        _cswin_block_kernel,
        out_shape=jax.ShapeDtypeStruct((Mp, D), _ACT_DTYPE),
        grid=(Mp // tm,),
        in_specs=[
            pl.BlockSpec((tm, D), lambda i: (i, 0)),
            _const_spec((1, D)), _const_spec((1, D)),
            _const_spec((D, D)), _const_spec((1, D)),
            _const_spec((D, D)), _const_spec((1, D)),
        ],
        out_specs=pl.BlockSpec((tm, D), lambda i: (i, 0)),
        compiler_params=_COMPILER_PARAMS_1D,
    )(tp, g, b, w1, c1, w2, c2)
    return out[:M] if Mp != M else out


# ----------------------------------------------------------------------------
# Kernel 5: segformer fuse -- 4-way channel concat folded into sum of matmuls
# ----------------------------------------------------------------------------
def _segfuse_kernel(f0_ref, f1_ref, f2_ref, f3_ref, w_ref, b_ref, o_ref):
    y = jnp.dot(f0_ref[...].astype(jnp.bfloat16), w_ref[0],
                preferred_element_type=jnp.float32)
    y = y + jnp.dot(f1_ref[...].astype(jnp.bfloat16), w_ref[1],
                    preferred_element_type=jnp.float32)
    y = y + jnp.dot(f2_ref[...].astype(jnp.bfloat16), w_ref[2],
                    preferred_element_type=jnp.float32)
    y = y + jnp.dot(f3_ref[...].astype(jnp.bfloat16), w_ref[3],
                    preferred_element_type=jnp.float32)
    y = y + b_ref[...]
    o_ref[...] = jnp.maximum(y, 0.0).astype(o_ref.dtype)


@jax.jit
def _segfuse_impl(f0, f1, f2, f3, w4, shift):
    M, E = f0.shape
    fixed = _W_COPIES * w4.size * 2 + 2 * E * 4
    per_row = 4 * 2 * E * 2 + 2 * E * 2 + 2 * E * 4
    tm, Mp = _row_tile(M, per_row, fixed)
    if Mp != M:
        pad = ((0, Mp - M), (0, 0))
        f0, f1, f2, f3 = [jnp.pad(f, pad) for f in (f0, f1, f2, f3)]
    row = pl.BlockSpec((tm, E), lambda i: (i, 0))
    out = pl.pallas_call(
        _segfuse_kernel,
        out_shape=jax.ShapeDtypeStruct((Mp, E), _ACT_DTYPE),
        grid=(Mp // tm,),
        in_specs=[row, row, row, row, _const_spec((4, E, E)), _const_spec((1, E))],
        out_specs=row,
        compiler_params=_COMPILER_PARAMS_1D,
    )(f0, f1, f2, f3, w4, shift)
    return out[:M] if Mp != M else out


# ----------------------------------------------------------------------------
# Conv / pooling / resize glue
# ----------------------------------------------------------------------------
def im2col(x, kh, kw, stride, pad):
    # TODO(synk): only used for the 3 strided convs (7x7 stem, layer2.0 conv1);
    # the column construction could move in-kernel (strided slab windows) to cut
    # the kh*kw-fold HBM blow-up for those layers.
    N, H, W, C = x.shape
    xp = jnp.pad(x, ((0, 0), (pad, pad), (pad, pad), (0, 0)))
    Ho = (H + 2 * pad - kh) // stride + 1
    Wo = (W + 2 * pad - kw) // stride + 1
    cols = []
    for i in range(kh):
        for j in range(kw):
            cols.append(
                lax.slice(
                    xp,
                    (0, i, j, 0),
                    (N, i + (Ho - 1) * stride + 1, j + (Wo - 1) * stride + 1, C),
                    (1, stride, stride, 1),
                )
            )
    patches = jnp.concatenate(cols, axis=-1)          # (N, Ho, Wo, kh*kw*C), bf16
    return patches.reshape(N * Ho * Wo, kh * kw * C), (N, Ho, Wo)


def conv2d(x, p, stride=1, pad=None, act="none", residual=None):
    """x: NHWC bf16.  p: dict(kh, kw, wk=(kh, kw*Cin, Cout) bf16 (BN-scale folded),
    shift=(1,Cout) f32)."""
    kh, kw = p["kh"], p["kw"]
    cin = p["wk"].shape[1] // kw
    cout = p["wk"].shape[2]
    if pad is None:
        pad = kh // 2

    if kh == 1 and kw == 1:
        if stride != 1:
            x = x[:, ::stride, ::stride, :]
        N, H, W, _ = x.shape
        a = x.reshape(N * H * W, cin)
        r = None if residual is None else residual.reshape(N * H * W, cout)
        y = _mm_fused(a, p["wk"][0], p["shift"], r, act=act, out_dtype=_ACT_DTYPE)
        return y.reshape(N, H, W, cout)

    if stride == 1:
        N, H, W, _ = x.shape
        Hp, Wp = H + 2 * pad, W + 2 * pad
        Ho, Wo = Hp - kh + 1, Wp - kw + 1
        tro = _choose_conv_tile(Ho, Wo, Wp, cin, cout, kh, kw, residual is not None)
        if tro is not None:
            xpad = jnp.pad(x, ((0, 0), (pad, pad), (pad, pad), (0, 0)))
            return _conv_direct_impl(xpad, p["wk"], p["shift"], residual,
                                     kh=kh, kw=kw, act=act, tro=tro)

    # Strided convs (7x7 stem, layer2.0 conv1) or maps too large for VMEM: bf16 im2col.
    cols, (N, Ho, Wo) = im2col(x, kh, kw, stride, pad)
    wmat = p["wk"].reshape(kh * kw * cin, cout)
    r = None if residual is None else residual.reshape(N * Ho * Wo, cout)
    y = _mm_fused(cols, wmat, p["shift"], r, act=act, out_dtype=_ACT_DTYPE)
    return y.reshape(N, Ho, Wo, cout)


def maxpool2d_3x3_s2(x):
    return lax.reduce_window(
        x, jnp.array(-jnp.inf, x.dtype), lax.max,
        (1, 3, 3, 1), (1, 2, 2, 1), [(0, 0), (1, 1), (1, 1), (0, 0)],
    )


def bilinear_resize(x, h, w):
    # matches F.interpolate(mode='bilinear', align_corners=False)
    N, _, _, C = x.shape
    return jax.image.resize(x, (N, h, w, C), method="bilinear")


# ----------------------------------------------------------------------------
# Deterministic parameter construction (BN scale folded into the weights)
# ----------------------------------------------------------------------------
class ParamGen:
    def __init__(self, seed=0):
        self.key = jax.random.PRNGKey(seed)

    def _next(self):
        self.key, k = jax.random.split(self.key)
        return k

    def conv(self, kh, kw, cin, cout):
        w = jax.random.normal(self._next(), (kh * kw, cin, cout), jnp.float32)
        w = w * jnp.sqrt(2.0 / (kh * kw * cin))
        scale = jnp.ones((cout,), jnp.float32)           # folded BN gamma / sqrt(var+eps)
        w = w * scale                                    # fold scale into the weights
        return dict(
            kh=kh, kw=kw,
            wk=w.reshape(kh, kw * cin, cout).astype(_W_DTYPE),   # (kh, kw*Cin, Cout)
            shift=jnp.zeros((1, cout), jnp.float32),             # conv bias / BN beta
        )

    def linear(self, cin, cout):
        return self.conv(1, 1, cin, cout)

    def grouped_linear(self, groups, cin, cout):
        w = jax.random.normal(self._next(), (groups, cin, cout), jnp.float32)
        w = w * jnp.sqrt(2.0 / (groups * cin))
        w = w * jnp.ones((cout,), jnp.float32)            # fold BN scale
        return dict(w=w.astype(_W_DTYPE),
                    shift=jnp.zeros((1, cout), jnp.float32))

    def dense(self, cin, cout):
        w = jax.random.normal(self._next(), (cin, cout), jnp.float32)
        w = w * jnp.sqrt(2.0 / cin)
        w = w * jnp.ones((cout,), jnp.float32)            # fold scale
        return dict(w=w.astype(_W_DTYPE),
                    shift=jnp.zeros((1, cout), jnp.float32))

    def ln(self, c):
        return dict(gamma=jnp.ones((1, c), jnp.float32),
                    beta=jnp.zeros((1, c), jnp.float32))


def make_basic_block(pg, cin, cout, stride):
    p = dict(conv1=pg.conv(3, 3, cin, cout), conv2=pg.conv(3, 3, cout, cout), stride=stride)
    if stride != 1 or cin != cout:
        p["ds"] = pg.conv(1, 1, cin, cout)
    return p


def make_layer(pg, cin, cout, nblocks, stride):
    blocks = [make_basic_block(pg, cin, cout, stride)]
    for _ in range(nblocks - 1):
        blocks.append(make_basic_block(pg, cout, cout, 1))
    return blocks


def make_segformer_head(pg, in_channels, embed_dim, num_classes):
    return dict(
        proj=[pg.linear(c, embed_dim) for c in in_channels],
        fuse=pg.grouped_linear(len(in_channels), embed_dim, embed_dim),
        pred=pg.dense(embed_dim, num_classes),
    )


def make_params(num_classes=7):
    pg = ParamGen(0)
    seg_chans = (64, 128, 128, 128)
    enc = dict(
        conv1=pg.conv(7, 7, 3, 64),
        layer1=make_layer(pg, 64, 64, 3, 1),
        layer2=make_layer(pg, 64, 128, 4, 2),
        layer3=make_layer(pg, 128, 256, 6, 1),   # conv1/downsample strides forced to 1 (as in reference)
        layer4=make_layer(pg, 256, 512, 3, 1),   # conv1/downsample strides forced to 1 (as in reference)
        head1=pg.linear(256, 128),               # TODO(synk): MixCfn def not provided; 1x1 conv+BN+ReLU stand-in
        head2=pg.linear(512, 128),
    )
    dec = dict(
        diff=[pg.grouped_linear(3, c, c) for c in seg_chans],  # TODO(synk): DiffFusionBlock def not provided
        cswin=[],
        up_change=make_segformer_head(pg, seg_chans, seg_chans[0], 1),
        up_cswin=make_segformer_head(pg, seg_chans, seg_chans[0], num_classes),
    )
    for c in seg_chans:
        dim = 3 * c
        blocks = []
        for _ in range(2):  # depth=2
            blocks.append(dict(ln=pg.ln(dim), fc1=pg.dense(dim, dim), fc2=pg.dense(dim, dim)))
        dec["cswin"].append(dict(blocks=blocks, dim=dim))
    return dict(enc=enc, dec=dec, seg_chans=seg_chans)


# ----------------------------------------------------------------------------
# Forward pass
# ----------------------------------------------------------------------------
def basic_block_fwd(x, p):
    identity = x
    out = conv2d(x, p["conv1"], stride=p["stride"], act="relu")
    if "ds" in p:
        identity = conv2d(x, p["ds"], stride=p["stride"], pad=0, act="none")
    # relu(bn2(conv2(out)) + identity), residual fused in the conv epilogue
    return conv2d(out, p["conv2"], stride=1, act="relu", residual=identity)


def encoder_single(x, enc):
    x = conv2d(x, enc["conv1"], stride=2, pad=3, act="relu")
    x = maxpool2d_3x3_s2(x)
    for b in enc["layer1"]:
        x = basic_block_fwd(x, b)
    x4 = x
    for b in enc["layer2"]:
        x = basic_block_fwd(x, b)
    x8 = x
    for b in enc["layer3"]:
        x = basic_block_fwd(x, b)
    x16 = conv2d(x, enc["head1"], pad=0, act="relu")
    for b in enc["layer4"]:
        x = basic_block_fwd(x, b)
    x32 = conv2d(x, enc["head2"], pad=0, act="relu")
    return (x4, x8, x16, x32)


def diff_fusion_fwd(x1, x2, p):
    # TODO(synk): DiffFusionBlock source not provided; stand-in:
    # relu(BN(1x1conv(cat[x1, x2, |x1-x2|]))) fused into one Pallas kernel
    # (no |x1-x2| / concat materialization in HBM).
    N, H, W, C = x1.shape
    y = _diff_fusion_impl(x1.reshape(-1, C), x2.reshape(-1, C), p["w"], p["shift"])
    return y.reshape(N, H, W, C)


def cswin_de_fwd(x, p):
    # TODO(synk): CSWin_De source not provided; cross-shaped window attention is omitted --
    # each depth-2 block is a residual token MLP (LN -> Linear -> GELU -> Linear),
    # fused into a single Pallas kernel per block (weights VMEM-resident).
    N, H, W, C = x.shape
    t = x.reshape(N * H * W, C)
    for blk in p["blocks"]:
        t = _cswin_block_impl(t, blk["ln"]["gamma"], blk["ln"]["beta"],
                              blk["fc1"]["w"], blk["fc1"]["shift"],
                              blk["fc2"]["w"], blk["fc2"]["shift"])
    return t.reshape(N, H, W, C)


def segformer_head_fwd(feats, p):
    # TODO(synk): segformer_head source not provided; standard SegFormer decode head
    # stand-in: per-scale 1x1 proj -> resize to 1/4 scale -> fused 4-way 1x1 fuse
    # (sum of row-split matmuls, no channel concat) -> tiny-N 1x1 pred in plain XLA.
    N, H0, W0, _ = feats[0].shape
    outs = []
    for f, proj in zip(feats, p["proj"]):
        y = conv2d(f, proj, pad=0, act="none")
        if y.shape[1] != H0 or y.shape[2] != W0:
            y = bilinear_resize(y, H0, W0)
        outs.append(y)
    E = outs[0].shape[-1]
    flat = [o.reshape(N * H0 * W0, E) for o in outs[::-1]]
    x = _segfuse_impl(flat[0], flat[1], flat[2], flat[3],
                      p["fuse"]["w"], p["fuse"]["shift"])
    # Cout is 1 or num_classes: output lanes << 128, so run the pred conv in XLA,
    # on bf16 inputs with f32 accumulation (no f32 upcast of the fused map).
    nc = p["pred"]["w"].shape[1]
    y = jnp.dot(x, p["pred"]["w"], preferred_element_type=jnp.float32)
    y = y + p["pred"]["shift"]
    return y.reshape(N, H0, W0, nc)


def decoder_fwd(x1f, x2f, dec, seg_chans):
    out = [diff_fusion_fwd(x1f[i], x2f[i], dec["diff"][i]) for i in range(len(x1f))]
    x_lcm1, x_lcm2, x_change = [], [], []
    for i in range(len(x1f)):
        x = jnp.concatenate([x1f[i], x2f[i], out[i]], axis=-1)
        x = cswin_de_fwd(x, dec["cswin"][i])
        c = seg_chans[i]
        x_lcm1.append(x[..., 0:c])
        x_lcm2.append(x[..., c:2 * c])
        x_change.append(x[..., 2 * c:])
    ch = segformer_head_fwd(x_change, dec["up_change"])
    xa = segformer_head_fwd(x_lcm1, dec["up_cswin"])
    xb = segformer_head_fwd(x_lcm2, dec["up_cswin"])
    return ch, xa, xb


def mcdnet_forward(img1_nchw, img2_nchw, params):
    """Inputs NCHW (PyTorch convention); internally NHWC bf16; outputs NCHW f32."""
    img1 = jnp.transpose(img1_nchw, (0, 2, 3, 1)).astype(_ACT_DTYPE)
    img2 = jnp.transpose(img2_nchw, (0, 2, 3, 1)).astype(_ACT_DTYPE)
    H, W = img1.shape[1], img1.shape[2]

    x1 = encoder_single(img1, params["enc"])
    x2 = encoder_single(img2, params["enc"])
    ch, xa, xb = decoder_fwd(x1, x2, params["dec"], params["seg_chans"])

    def up(y):
        N, _, _, C = y.shape
        y = jax.image.resize(y.astype(jnp.float32), (N, H, W, C), method="bilinear")
        return jnp.transpose(y, (0, 3, 1, 2))

    return up(ch), up(xa), up(xb)


# ----------------------------------------------------------------------------
if __name__ == "__main__":
    num_classes = 7
    img_size = 32  # small, divisible by 32 (ResNet stem + maxpool)
    batch = 2

    params = make_params(num_classes=num_classes)

    key = jax.random.PRNGKey(0)
    k1, k2 = jax.random.split(key)
    img1 = jax.random.normal(k1, (batch, 3, img_size, img_size), jnp.float32)
    img2 = jax.random.normal(k2, (batch, 3, img_size, img_size), jnp.float32)

    change, out1, out2 = mcdnet_forward(img1, img2, params)
    change, out1, out2 = jax.block_until_ready((change, out1, out2))

    assert change.shape == (batch, 1, img_size, img_size), change.shape
    assert out1.shape == (batch, num_classes, img_size, img_size), out1.shape
    assert out2.shape == (batch, num_classes, img_size, img_size), out2.shape
    assert jnp.all(jnp.isfinite(change)) and jnp.all(jnp.isfinite(out1)) and jnp.all(jnp.isfinite(out2))
    print("KERNEL_OK")
</pallas_src>

<mosaic_0001>
module attributes {stable_mosaic.version = 11 : i64} {
  func.func @kernel(%arg0: i32, %arg1: memref<512x147xbf16, #tpu.memory_space<vmem>>, %arg2: memref<147x64xbf16, #tpu.memory_space<vmem>>, %arg3: memref<1x64xf32, #tpu.memory_space<vmem>>, %arg4: memref<512x64xbf16, #tpu.memory_space<vmem>>) attributes {dimension_semantics = [#tpu.dimension_semantics<parallel>], iteration_bounds = array<i64: 1>, scalar_prefetch = 0 : i64, scratch_operands = 0 : i64, tpu.core_type = #tpu.core_type<tc>, window_params = [{transform_indices = @transform_0, window_bounds = array<i64: 512, 147>}, {pipeline_mode = #tpu.pipeline_mode<synchronous>, transform_indices = @transform_1, window_bounds = array<i64: 147, 64>}, {pipeline_mode = #tpu.pipeline_mode<synchronous>, transform_indices = @transform_2, window_bounds = array<i64: 1, 64>}, {transform_indices = @transform_3, window_bounds = array<i64: 512, 64>}]} {
    %c0 = arith.constant 0 : index
    %c0_0 = arith.constant 0 : index
    %0 = vector.load %arg1[%c0, %c0_0] : memref<512x147xbf16, #tpu.memory_space<vmem>>, vector<512x147xbf16>
    %c0_1 = arith.constant 0 : index
    %c0_2 = arith.constant 0 : index
    %1 = vector.load %arg2[%c0_1, %c0_2] : memref<147x64xbf16, #tpu.memory_space<vmem>>, vector<147x64xbf16>
    %cst = arith.constant dense<0.000000e+00> : vector<512x64xf32>
    %2 = tpu.matmul %0, %1, %cst {dimension_numbers = #tpu.dot_dimension_numbers<[1], [0], [0], [1], [0, 0, 1, 1], [], []>} : vector<512x147xbf16>, vector<147x64xbf16>, vector<512x64xf32> -> vector<512x64xf32>
    %c0_3 = arith.constant 0 : index
    %c0_4 = arith.constant 0 : index
    %3 = vector.load %arg3[%c0_3, %c0_4] : memref<1x64xf32, #tpu.memory_space<vmem>>, vector<1x64xf32>
    %4 = vector.broadcast %3 : vector<1x64xf32> to vector<512x64xf32>
    %5 = arith.addf %2, %4 : vector<512x64xf32>
    %cst_5 = arith.constant 0.000000e+00 : f32
    %6 = vector.broadcast %cst_5 : f32 to vector<512x64xf32>
    %7 = arith.maximumf %5, %6 : vector<512x64xf32>
    %8 = arith.truncf %7 : vector<512x64xf32> to vector<512x64xbf16>
    %c0_6 = arith.constant 0 : index
    %c0_7 = arith.constant 0 : index
    %9 = vector.load %arg4[%c0_6, %c0_7] : memref<512x64xbf16, #tpu.memory_space<vmem>>, vector<512x64xbf16>
    tpu.vector_store %arg4[%c0_6, %c0_7], %8 {strides = array<i32>} : memref<512x64xbf16, #tpu.memory_space<vmem>>, vector<512x64xbf16>,
    return
  }
  func.func @transform_0(%arg0: i32) -> (i32, i32) {
    %c0_i32 = arith.constant 0 : i32
    %c0_i32_0 = arith.constant 0 : i32
    return %arg0, %c0_i32 : i32, i32
  }
  func.func @transform_1(%arg0: i32) -> (i32, i32) {
    %c0_i32 = arith.constant 0 : i32
    %c0_i32_0 = arith.constant 0 : i32
    %c0_i32_1 = arith.constant 0 : i32
    return %c0_i32, %c0_i32_0 : i32, i32
  }
  func.func @transform_2(%arg0: i32) -> (i32, i32) {
    %c0_i32 = arith.constant 0 : i32
    %c0_i32_0 = arith.constant 0 : i32
    %c0_i32_1 = arith.constant 0 : i32
    return %c0_i32, %c0_i32_0 : i32, i32
  }
  func.func @transform_3(%arg0: i32) -> (i32, i32) {
    %c0_i32 = arith.constant 0 : i32
    %c0_i32_0 = arith.constant 0 : i32
    return %arg0, %c0_i32 : i32, i32
  }
}

</mosaic_0001>

<bundles_post_ra>
// kernel: _mm_fused.1
= control target key start
LH: loop header
LB: loop body
LE: loop exit
PB: predicated region body
PF: predicated region fallthrough
CT: control target
= control target key end

     0   :  { %v1595_v0 = vmov 0   ;;  %vm450_vm0 = vcmask 154624   ;;  %vm547_vm1 = vcmask 1040384   ;;  %vm548_vm2 = vcmask 1041408   ;;  %s2196_s1 = inlined_call_operand.vmem [shape: bf16[147,64], index: 1, kind: input, shape index: {}]   ;;  %s2197_s0 = inlined_call_operand.vmem [shape: bf16[512,147], index: 0, kind: input, shape index: {}]   ;;  %s2198_s2 = inlined_call_operand.vmem [shape: f32[1,64], index: 2, kind: input, shape index: {}]   ;;  %s2199_s3 = inlined_call_operand.vmem [shape: bf16[512,64], index: 3, kind: output, shape index: {}]  }
   0x1   :  { %554 = vmatprep.subr.bf16.mxu0 %v1595_v0  ;;  %1467 = vmatprep.subr.bf16.mxu1 %v1595_v0  ;;  %v1489_v1 = vld [vmem:[%s2196_s1 + $0x38] sm:$0xff]   ;;  %v1490_v2 = vld [vmem:[%s2196_s1 + $0x30] sm:$0xff]   ;;  %v1491_v3 = vld [vmem:[%s2196_s1 + $0x28] sm:$0xff]   ;;  %v1596_v10 = vmov 65535   ;;  %vm1163_vm3 = vcmask 519168  }
   0x2   :  { %555 = vmatpush1.bf16.msra.mxu0 %v1489_v1  ;;  %1477 = vmatpush1.bf16.msra.mxu1 %v1489_v1  ;;  %v1492_v4 = vld [vmem:[%s2196_s1 + $0x20] sm:$0xff]   ;;  %v1493_v7 = vld [vmem:[%s2196_s1 + $0x18] sm:$0xff]   ;;  %v1494_v8 = vld [vmem:[%s2196_s1 + $0x10] sm:$0xff]   ;;  %v549_v11 = vsel %vm547_vm1, 4294967295, %v1596_v10 }
   0x3   :  { %556 = vmatprep.subr.bf16.mxu0 %v1595_v0  ;;  %1468 = vmatprep.subr.bf16.mxu1 %v1595_v0  ;;  %v1501_v5 = vld [vmem:[%s2197_s0 + $0x4] ss:$8 sps:$4 sm:$0xff]   ;;  %v1497_v13 = vld [vmem:[%s2196_s1 + $0x48] ss:$0 sps:$4 sm:$0x33]   ;;  %v550_v14 = vsel %vm548_vm2, %v549_v11, 0 }
   0x4   :  { %1307 = vmatprep.mubr.msk.bf16.mxu0 %vm450_vm0, %v1501_v5  ;;  %v1504_v6 = vld [vmem:[%s2197_s0 + $0x104] ss:$8 sps:$4 sm:$0xff]   ;;  %v552_v15 = vand.u32 %v1497_v13, %v550_v14  ;;  %v1499_v17 = vld [vmem:[%s2197_s0] ss:$8 sps:$4 sm:$0xff]   ;;  %v1505_v19 = vld [vmem:[%s2197_s0 + $0x14] ss:$8 sps:$4 sm:$0xff]  }
   0x5   :  { %1323 = vmatprep.mubr.msk.bf16.mxu1 %vm450_vm0, %v1504_v6  ;;  %v1495_v9 = vld [vmem:[%s2196_s1 + $0x8] sm:$0xff]   ;;  %v1496_v12 = vld [vmem:[%s2196_s1] sm:$0xff]   ;;  %v1507_v20 = vld [vmem:[%s2197_s0 + $0x114] ss:$8 sps:$4 sm:$0xff]  }
   0x6   :  { %557 = vmatpush1.bf16.msra.mxu0 %v1490_v2  ;;  %1478 = vmatpush1.bf16.msra.mxu1 %v1490_v2  ;;  %v1498_v16 = vld [vmem:[%s2196_s1 + $0x40] sm:$0xff]   ;;  %v1509_v21 = vld [vmem:[%s2197_s0 + $0x10] ss:$8 sps:$4 sm:$0xff]   ;;  %v1517_v27 = vld [vmem:[%s2197_s0 + $0x34] ss:$8 sps:$4 sm:$0xff]  }
   0x7   :  { %558 = vmatprep.subr.bf16.mxu0 %v1595_v0  ;;  %1469 = vmatprep.subr.bf16.mxu1 %v1595_v0  ;;  %v1502_v18 = vld [vmem:[%s2197_s0 + $0x100] ss:$8 sps:$4 sm:$0xff]   ;;  %v1510_v22 = vld [vmem:[%s2197_s0 + $0x110] ss:$8 sps:$4 sm:$0xff]   ;;  %v1511_v23 = vld [vmem:[%s2197_s0 + $0x24] ss:$8 sps:$4 sm:$0xff]  }
   0x8   :  { %v1513_v24 = vld [vmem:[%s2197_s0 + $0x124] ss:$8 sps:$4 sm:$0xff]   ;;  %v1515_v25 = vld [vmem:[%s2197_s0 + $0x20] ss:$8 sps:$4 sm:$0xff]   ;;  %v1519_v28 = vld [vmem:[%s2197_s0 + $0x134] ss:$8 sps:$4 sm:$0xff]  }
   0x9   :  { %v1516_v26 = vld [vmem:[%s2197_s0 + $0x120] ss:$8 sps:$4 sm:$0xff]   ;;  %v1521_v29 = vld [vmem:[%s2197_s0 + $0x30] ss:$8 sps:$4 sm:$0xff]   ;;  %v1523_v31 = vld [vmem:[%s2197_s0 + $0x44] ss:$8 sps:$4 sm:$0xff]  }
   0xa   :  { %559 = vmatpush1.bf16.msra.mxu0 %v1491_v3  ;;  %1479 = vmatpush1.bf16.msra.mxu1 %v1491_v3  ;;  %v1522_v30 = vld [vmem:[%s2197_s0 + $0x130] ss:$8 sps:$4 sm:$0xff]   ;;  %v1525_v32 = vld [vmem:[%s2197_s0 + $0x144] ss:$8 sps:$4 sm:$0xff]   ;;  %v1527_v33 = vld [vmem:[%s2197_s0 + $0x40] ss:$8 sps:$4 sm:$0xff]  }
   0xb   :  { %560 = vmatprep.subr.bf16.mxu0 %v1595_v0  ;;  %1470 = vmatprep.subr.bf16.mxu1 %v1595_v0  ;;  %v1528_v34 = vld [vmem:[%s2197_s0 + $0x140] ss:$8 sps:$4 sm:$0xff]   ;;  %v1529_v35 = vld [vmem:[%s2197_s0 + $0x54] ss:$8 sps:$4 sm:$0xff]   ;;  %v1533_v37 = vld [vmem:[%s2197_s0 + $0x50] ss:$8 sps:$4 sm:$0xff]  }
   0xc   :  { %v1531_v36 = vld [vmem:[%s2197_s0 + $0x154] ss:$8 sps:$4 sm:$0xff]   ;;  %v1534_v38 = vld [vmem:[%s2197_s0 + $0x150] ss:$8 sps:$4 sm:$0xff]   ;;  %v1535_v39 = vld [vmem:[%s2197_s0 + $0x64] ss:$8 sps:$4 sm:$0xff]  }
   0xd   :  { %v1537_v40 = vld [vmem:[%s2197_s0 + $0x164] ss:$8 sps:$4 sm:$0xff]   ;;  %v1539_v41 = vld [vmem:[%s2197_s0 + $0x60] ss:$8 sps:$4 sm:$0xff]   ;;  %v1541_v43 = vld [vmem:[%s2197_s0 + $0x74] ss:$8 sps:$4 sm:$0xff]  }
   0xe   :  { %561 = vmatpush1.bf16.msra.mxu0 %v1492_v4  ;;  %1480 = vmatpush1.bf16.msra.mxu1 %v1492_v4  ;;  %v1540_v42 = vld [vmem:[%s2197_s0 + $0x160] ss:$8 sps:$4 sm:$0xff]   ;;  %v1543_v44 = vld [vmem:[%s2197_s0 + $0x174] ss:$8 sps:$4 sm:$0xff]   ;;  %v1545_v45 = vld [vmem:[%s2197_s0 + $0x70] ss:$8 sps:$4 sm:$0xff]  }
   0xf   :  { %562 = vmatprep.subr.bf16.mxu0 %v1595_v0  ;;  %1471 = vmatprep.subr.bf16.mxu1 %v1595_v0  ;;  %v1546_v46 = vld [vmem:[%s2197_s0 + $0x170] ss:$8 sps:$4 sm:$0xff]   ;;  %v1547_v47 = vld [vmem:[%s2197_s0 + $0x84] ss:$8 sps:$4 sm:$0xff]   ;;  %v1551_v49 = vld [vmem:[%s2197_s0 + $0x80] ss:$8 sps:$4 sm:$0xff]  }
  0x10   :  { %v1549_v48 = vld [vmem:[%s2197_s0 + $0x184] ss:$8 sps:$4 sm:$0xff]   ;;  %v1552_v50 = vld [vmem:[%s2197_s0 + $0x180] ss:$8 sps:$4 sm:$0xff]   ;;  %v1553_v51 = vld [vmem:[%s2197_s0 + $0x94] ss:$8 sps:$4 sm:$0xff]  }
  0x11   :  { %v1555_v52 = vld [vmem:[%s2197_s0 + $0x194] ss:$8 sps:$4 sm:$0xff]   ;;  %v1557_v53 = vld [vmem:[%s2197_s0 + $0x90] ss:$8 sps:$4 sm:$0xff]   ;;  %v1559_v55 = vld [vmem:[%s2197_s0 + $0xa4] ss:$8 sps:$4 sm:$0xff]  }
  0x12   :  { %563 = vmatpush1.bf16.msra.mxu0 %v1493_v7  ;;  %1481 = vmatpush1.bf16.msra.mxu1 %v1493_v7  ;;  %v1558_v54 = vld [vmem:[%s2197_s0 + $0x190] ss:$8 sps:$4 sm:$0xff]   ;;  %v1561_v56 = vld [vmem:[%s2197_s0 + $0x1a4] ss:$8 sps:$4 sm:$0xff]   ;;  %v1563_v57 = vld [vmem:[%s2197_s0 + $0xa0] ss:$8 sps:$4 sm:$0xff]  }
  0x13   :  { %564 = vmatprep.subr.bf16.mxu0 %v1595_v0  ;;  %1472 = vmatprep.subr.bf16.mxu1 %v1595_v0  ;;  %v1564_v58 = vld [vmem:[%s2197_s0 + $0x1a0] ss:$8 sps:$4 sm:$0xff]   ;;  %v1565_v59 = vld [vmem:[%s2197_s0 + $0xb4] ss:$8 sps:$4 sm:$0xff]   ;;  %v1569_v61 = vld [vmem:[%s2197_s0 + $0xb0] ss:$8 sps:$4 sm:$0xff]  }
  0x14   :  { %v1567_v60 = vld [vmem:[%s2197_s0 + $0x1b4] ss:$8 sps:$4 sm:$0xff]   ;;  %v1570_v62 = vld [vmem:[%s2197_s0 + $0x1b0] ss:$8 sps:$4 sm:$0xff]   ;;  %v1571_v63 = vld [vmem:[%s2197_s0 + $0xc4] ss:$8 sps:$4 sm:$0xff]  }
  0x15   :  { %v1575_v1 = vld [vmem:[%s2197_s0 + $0xc0] ss:$8 sps:$4 sm:$0xff]   ;;  %v1577_v3 = vld [vmem:[%s2197_s0 + $0xd4] ss:$8 sps:$4 sm:$0xff]   ;;  %v1581_v5 = vld [vmem:[%s2197_s0 + $0xd0] ss:$8 sps:$4 sm:$0xff]  }
  0x16   :  { %565 = vmatpush1.bf16.msra.mxu0 %v1494_v8  ;;  %1482 = vmatpush1.bf16.msra.mxu1 %v1494_v8  ;;  %v1576_v2 = vld [vmem:[%s2197_s0 + $0x1c0] ss:$8 sps:$4 sm:$0xff]   ;;  %v1579_v4 = vld [vmem:[%s2197_s0 + $0x1d4] ss:$8 sps:$4 sm:$0xff]   ;;  %v1582_v6 = vld [vmem:[%s2197_s0 + $0x1d0] ss:$8 sps:$4 sm:$0xff]  }
  0x17   :  { %566 = vmatprep.subr.bf16.mxu0 %v1595_v0  ;;  %1473 = vmatprep.subr.bf16.mxu1 %v1595_v0  ;;  %v1583_v7 = vld [vmem:[%s2197_s0 + $0xe4] ss:$8 sps:$4 sm:$0xff]   ;;  %v1588_v10 = vld [vmem:[%s2197_s0 + $0x1e0] ss:$8 sps:$4 sm:$0xff]   ;;  %v1589_v11 = vld [vmem:[%s2197_s0 + $0xf4] ss:$8 sps:$4 sm:$0xff]  }
  0x18   :  { %v1585_v8 = vld [vmem:[%s2197_s0 + $0x1e4] ss:$8 sps:$4 sm:$0xff]   ;;  %v1593_v13 = vld [vmem:[%s2197_s0 + $0xf0] ss:$8 sps:$4 sm:$0xff]  }
  0x19   :  { %v1594_v14 = vld [vmem:[%s2197_s0 + $0x1f0] ss:$8 sps:$4 sm:$0xff]  }
  0x1a   :  { %567 = vmatpush1.bf16.msra.mxu0 %v1495_v9  ;;  %1483 = vmatpush1.bf16.msra.mxu1 %v1495_v9  ;;  %v1587_v9 = vld [vmem:[%s2197_s0 + $0xe0] ss:$8 sps:$4 sm:$0xff]  }
  0x1b   :  { %568 = vmatprep.subr.bf16.mxu0 %v1595_v0  ;;  %1474 = vmatprep.subr.bf16.mxu1 %v1595_v0 }
  0x1e   :  { %569 = vmatpush1.bf16.msra.mxu0 %v1496_v12  ;;  %1484 = vmatpush1.bf16.msra.mxu1 %v1496_v12  ;;  %v1591_v12 = vld [vmem:[%s2197_s0 + $0x1f4] ss:$8 sps:$4 sm:$0xff]  }
  0x1f   :  { %582 = vmatprep.subr.bf16.mxu0 %v1595_v0  ;;  %1475 = vmatprep.subr.bf16.mxu1 %v1595_v0 }
  0x22   :  { %583 = vmatpush2.bf16.msra.mxu0 %v552_v15  ;;  %1485 = vmatpush2.bf16.msra.mxu1 %v552_v15  ;;  %v1874_v15 = vld [vmem:[%s2198_s2] ss:$0 sm:$0xff] }
  0x23   :  { %584 = vmatprep.subr.bf16.mxu0 %v1595_v0  ;;  %1476 = vmatprep.subr.bf16.mxu1 %v1595_v0  ;;  %v1573_v0 = vld [vmem:[%s2197_s0 + $0x1c4] ss:$8 sps:$4 sm:$0xff]  }
  0x26   :  { %585 = vmatpush2.bf16.msra.mxu0 %v1498_v16  ;;  %1486 = vmatpush2.bf16.msra.mxu1 %v1498_v16 }
  0x29   :  { %587 = vmatmul.mubr.bf16.vlgmr.msra.gmra.mxu0 %v1499_v17  ;;  %715 = vmatmul.mubr.bf16.vlgmr.msra.gmra.mxu1 %v1502_v18 }
  0x2a   :  { %1308 = vmatprep.mubr.msk.bf16.mxu0 %vm450_vm0, %v1505_v19  ;;  %1324 = vmatprep.mubr.msk.bf16.mxu1 %vm450_vm0, %v1507_v20 }
  0x31   :  { %595 = vmatmul.mubr.bf16.gmra.mxu0 %v1509_v21  ;;  %723 = vmatmul.mubr.bf16.gmra.mxu1 %v1510_v22 }
  0x32   :  { %1309 = vmatprep.mubr.msk.bf16.mxu0 %vm450_vm0, %v1511_v23  ;;  %1325 = vmatprep.mubr.msk.bf16.mxu1 %vm450_vm0, %v1513_v24 }
  0x39   :  { %603 = vmatmul.mubr.bf16.gmra.mxu0 %v1515_v25  ;;  %731 = vmatmul.mubr.bf16.gmra.mxu1 %v1516_v26 }
  0x3a   :  { %1310 = vmatprep.mubr.msk.bf16.mxu0 %vm450_vm0, %v1517_v27  ;;  %1326 = vmatprep.mubr.msk.bf16.mxu1 %vm450_vm0, %v1519_v28 }
  0x41   :  { %611 = vmatmul.mubr.bf16.gmra.mxu0 %v1521_v29  ;;  %739 = vmatmul.mubr.bf16.gmra.mxu1 %v1522_v30 }
  0x42   :  { %1311 = vmatprep.mubr.msk.bf16.mxu0 %vm450_vm0, %v1523_v31  ;;  %1327 = vmatprep.mubr.msk.bf16.mxu1 %vm450_vm0, %v1525_v32 }
  0x49   :  { %619 = vmatmul.mubr.bf16.gmra.mxu0 %v1527_v33  ;;  %747 = vmatmul.mubr.bf16.gmra.mxu1 %v1528_v34 }
  0x4a   :  { %1312 = vmatprep.mubr.msk.bf16.mxu0 %vm450_vm0, %v1529_v35  ;;  %1328 = vmatprep.mubr.msk.bf16.mxu1 %vm450_vm0, %v1531_v36 }
  0x51   :  { %627 = vmatmul.mubr.bf16.gmra.mxu0 %v1533_v37  ;;  %755 = vmatmul.mubr.bf16.gmra.mxu1 %v1534_v38 }
  0x52   :  { %1313 = vmatprep.mubr.msk.bf16.mxu0 %vm450_vm0, %v1535_v39  ;;  %1329 = vmatprep.mubr.msk.bf16.mxu1 %vm450_vm0, %v1537_v40 }
  0x59   :  { %635 = vmatmul.mubr.bf16.gmra.mxu0 %v1539_v41  ;;  %763 = vmatmul.mubr.bf16.gmra.mxu1 %v1540_v42 }
  0x5a   :  { %1314 = vmatprep.mubr.msk.bf16.mxu0 %vm450_vm0, %v1541_v43  ;;  %1330 = vmatprep.mubr.msk.bf16.mxu1 %vm450_vm0, %v1543_v44 }
  0x61   :  { %643 = vmatmul.mubr.bf16.gmra.mxu0 %v1545_v45  ;;  %771 = vmatmul.mubr.bf16.gmra.mxu1 %v1546_v46 }
  0x62   :  { %1315 = vmatprep.mubr.msk.bf16.mxu0 %vm450_vm0, %v1547_v47  ;;  %1331 = vmatprep.mubr.msk.bf16.mxu1 %vm450_vm0, %v1549_v48 }
  0x69   :  { %651 = vmatmul.mubr.bf16.gmra.mxu0 %v1551_v49  ;;  %779 = vmatmul.mubr.bf16.gmra.mxu1 %v1552_v50 }
  0x6a   :  { %1316 = vmatprep.mubr.msk.bf16.mxu0 %vm450_vm0, %v1553_v51  ;;  %1332 = vmatprep.mubr.msk.bf16.mxu1 %vm450_vm0, %v1555_v52 }
  0x71   :  { %659 = vmatmul.mubr.bf16.gmra.mxu0 %v1557_v53  ;;  %787 = vmatmul.mubr.bf16.gmra.mxu1 %v1558_v54 }
  0x72   :  { %1317 = vmatprep.mubr.msk.bf16.mxu0 %vm450_vm0, %v1559_v55  ;;  %1333 = vmatprep.mubr.msk.bf16.mxu1 %vm450_vm0, %v1561_v56 }
  0x79   :  { %667 = vmatmul.mubr.bf16.gmra.mxu0 %v1563_v57  ;;  %795 = vmatmul.mubr.bf16.gmra.mxu1 %v1564_v58 }
  0x7a   :  { %1318 = vmatprep.mubr.msk.bf16.mxu0 %vm450_vm0, %v1565_v59  ;;  %1334 = vmatprep.mubr.msk.bf16.mxu1 %vm450_vm0, %v1567_v60 }
  0x81   :  { %675 = vmatmul.mubr.bf16.gmra.mxu0 %v1569_v61  ;;  %803 = vmatmul.mubr.bf16.gmra.mxu1 %v1570_v62 }
  0x82   :  { %1319 = vmatprep.mubr.msk.bf16.mxu0 %vm450_vm0, %v1571_v63  ;;  %1335 = vmatprep.mubr.msk.bf16.mxu1 %vm450_vm0, %v1573_v0 }
  0x89   :  { %683 = vmatmul.mubr.bf16.gmra.mxu0 %v1575_v1  ;;  %811 = vmatmul.mubr.bf16.gmra.mxu1 %v1576_v2 }
  0x8a   :  { %1320 = vmatprep.mubr.msk.bf16.mxu0 %vm450_vm0, %v1577_v3  ;;  %1336 = vmatprep.mubr.msk.bf16.mxu1 %vm450_vm0, %v1579_v4 }
  0x91   :  { %691 = vmatmul.mubr.bf16.gmra.mxu0 %v1581_v5  ;;  %819 = vmatmul.mubr.bf16.gmra.mxu1 %v1582_v6 }
  0x92   :  { %1321 = vmatprep.mubr.msk.bf16.mxu0 %vm450_vm0, %v1583_v7  ;;  %1337 = vmatprep.mubr.msk.bf16.mxu1 %vm450_vm0, %v1585_v8 }
  0x99   :  { %699 = vmatmul.mubr.bf16.gmra.mxu0 %v1587_v9  ;;  %827 = vmatmul.mubr.bf16.gmra.mxu1 %v1588_v10 }
  0x9a   :  { %1322 = vmatprep.mubr.msk.bf16.mxu0 %vm450_vm0, %v1589_v11  ;;  %1338 = vmatprep.mubr.msk.bf16.mxu1 %vm450_vm0, %v1591_v12 }
  0xa1   :  { %707 = vmatmul.mubr.bf16.gmra.mxu0 %v1593_v13  ;;  %835 = vmatmul.mubr.bf16.gmra.mxu1 %v1594_v14 }
  0xe9   :  { %v588_v16 = vpop.f32.mrf.mxu0  ;;  %v716_v17 = vpop.f32.mrf.mxu1 }
  0xea   :  { %v589_v18 = vadd.f32 %v1874_v15, %v588_v16  ;;  %v717_v19 = vadd.f32 %v1874_v15, %v716_v17 }
  0xeb   :  { %v590_v20 = vpop.f32.mrf.mxu0  ;;  %v718_v21 = vpop.f32.mrf.mxu1 }
  0xec   :  { %v843_v22 = vmax.f32 %v589_v18, 0.0  ;;  %v875_v23 = vmax.f32 %v717_v19, 0.0 }
  0xed   :  { %v591_v24 = vpop.f32.mrf.mxu0  ;;  %v719_v25 = vpop.f32.mrf.mxu1 }
  0xee   :  { %v1403_v26 = vpack.c.bf16 %v843_v22, %v843_v22  ;;  %v1435_v27 = vpack.c.bf16 %v875_v23, %v875_v23  ;;  %v592_v28 = vadd.f32 %v1874_v15, %v591_v24  ;;  %v720_v29 = vadd.f32 %v1874_v15, %v719_v25 }
  0xef   :  { %v593_v30 = vpop.f32.mrf.mxu0  ;;  %v721_v31 = vpop.f32.mrf.mxu1 }
  0xf0   :  { %1164 = vst.msk [vmem:[%s2199_s3] sm:$0xf] %vm1163_vm3, %v1403_v26  ;;  %1196 = vst.msk [vmem:[%s2199_s3 + $0x80] sm:$0xf] %vm1163_vm3, %v1435_v27  ;;  %v844_v32 = vmax.f32 %v592_v28, 0.0  ;;  %v876_v33 = vmax.f32 %v720_v29, 0.0 }
  0xf1   :  { %v596_v34 = vpop.f32.mrf.mxu0  ;;  %v724_v35 = vpop.f32.mrf.mxu1 }
  0xf2   :  { %v1404_v36 = vpack.c.bf16 %v844_v32, %v844_v32  ;;  %v1436_v37 = vpack.c.bf16 %v876_v33, %v876_v33  ;;  %v597_v38 = vadd.f32 %v1874_v15, %v596_v34  ;;  %v725_v39 = vadd.f32 %v1874_v15, %v724_v35 }
  0xf3   :  { %v598_v40 = vpop.f32.mrf.mxu0  ;;  %v726_v41 = vpop.f32.mrf.mxu1 }
  0xf4   :  { %1165 = vst.msk [vmem:[%s2199_s3 + $0x4] sm:$0xf] %vm1163_vm3, %v1404_v36  ;;  %1197 = vst.msk [vmem:[%s2199_s3 + $0x84] sm:$0xf] %vm1163_vm3, %v1436_v37  ;;  %v845_v42 = vmax.f32 %v597_v38, 0.0  ;;  %v877_v43 = vmax.f32 %v725_v39, 0.0 }
  0xf5   :  { %v599_v44 = vpop.f32.mrf.mxu0  ;;  %v727_v45 = vpop.f32.mrf.mxu1 }
  0xf6   :  { %v1405_v46 = vpack.c.bf16 %v845_v42, %v845_v42  ;;  %v1437_v47 = vpack.c.bf16 %v877_v43, %v877_v43  ;;  %v600_v48 = vadd.f32 %v1874_v15, %v599_v44  ;;  %v728_v49 = vadd.f32 %v1874_v15, %v727_v45 }
  0xf7   :  { %v601_v50 = vpop.f32.mrf.mxu0  ;;  %v729_v51 = vpop.f32.mrf.mxu1 }
  0xf8   :  { %1166 = vst.msk [vmem:[%s2199_s3 + $0x8] sm:$0xf] %vm1163_vm3, %v1405_v46  ;;  %1198 = vst.msk [vmem:[%s2199_s3 + $0x88] sm:$0xf] %vm1163_vm3, %v1437_v47  ;;  %v846_v52 = vmax.f32 %v600_v48, 0.0  ;;  %v878_v53 = vmax.f32 %v728_v49, 0.0 }
  0xf9   :  { %v604_v54 = vpop.f32.mrf.mxu0  ;;  %v732_v55 = vpop.f32.mrf.mxu1 }
  0xfa   :  { %v1406_v56 = vpack.c.bf16 %v846_v52, %v846_v52  ;;  %v1438_v57 = vpack.c.bf16 %v878_v53, %v878_v53  ;;  %v605_v58 = vadd.f32 %v1874_v15, %v604_v54  ;;  %v733_v59 = vadd.f32 %v1874_v15, %v732_v55 }
  0xfb   :  { %v606_v60 = vpop.f32.mrf.mxu0  ;;  %v734_v61 = vpop.f32.mrf.mxu1 }
  0xfc   :  { %1167 = vst.msk [vmem:[%s2199_s3 + $0xc] sm:$0xf] %vm1163_vm3, %v1406_v56  ;;  %1199 = vst.msk [vmem:[%s2199_s3 + $0x8c] sm:$0xf] %vm1163_vm3, %v1438_v57  ;;  %v847_v62 = vmax.f32 %v605_v58, 0.0  ;;  %v879_v63 = vmax.f32 %v733_v59, 0.0 }
  0xfd   :  { %v607_v0 = vpop.f32.mrf.mxu0  ;;  %v735_v1 = vpop.f32.mrf.mxu1 }
  0xfe   :  { %v1407_v2 = vpack.c.bf16 %v847_v62, %v847_v62  ;;  %v1439_v3 = vpack.c.bf16 %v879_v63, %v879_v63  ;;  %v608_v4 = vadd.f32 %v1874_v15, %v607_v0  ;;  %v736_v5 = vadd.f32 %v1874_v15, %v735_v1 }
  0xff   :  { %v609_v6 = vpop.f32.mrf.mxu0  ;;  %v737_v7 = vpop.f32.mrf.mxu1 }
 0x100   :  { %1168 = vst.msk [vmem:[%s2199_s3 + $0x10] sm:$0xf] %vm1163_vm3, %v1407_v2  ;;  %1200 = vst.msk [vmem:[%s2199_s3 + $0x90] sm:$0xf] %vm1163_vm3, %v1439_v3  ;;  %v848_v8 = vmax.f32 %v608_v4, 0.0  ;;  %v880_v9 = vmax.f32 %v736_v5, 0.0 }
 0x101   :  { %v612_v10 = vpop.f32.mrf.mxu0  ;;  %v740_v11 = vpop.f32.mrf.mxu1 }
 0x102   :  { %v1408_v12 = vpack.c.bf16 %v848_v8, %v848_v8  ;;  %v1440_v13 = vpack.c.bf16 %v880_v9, %v880_v9  ;;  %v613_v14 = vadd.f32 %v1874_v15, %v612_v10  ;;  %v741_v16 = vadd.f32 %v1874_v15, %v740_v11 }
 0x103   :  { %v614_v17 = vpop.f32.mrf.mxu0  ;;  %v742_v18 = vpop.f32.mrf.mxu1 }
 0x104   :  { %1169 = vst.msk [vmem:[%s2199_s3 + $0x14] sm:$0xf] %vm1163_vm3, %v1408_v12  ;;  %1201 = vst.msk [vmem:[%s2199_s3 + $0x94] sm:$0xf] %vm1163_vm3, %v1440_v13  ;;  %v849_v19 = vmax.f32 %v613_v14, 0.0  ;;  %v881_v20 = vmax.f32 %v741_v16, 0.0 }
 0x105   :  { %v615_v21 = vpop.f32.mrf.mxu0  ;;  %v743_v22 = vpop.f32.mrf.mxu1 }
 0x106   :  { %v1409_v23 = vpack.c.bf16 %v849_v19, %v849_v19  ;;  %v1441_v24 = vpack.c.bf16 %v881_v20, %v881_v20  ;;  %v616_v25 = vadd.f32 %v1874_v15, %v615_v21  ;;  %v744_v26 = vadd.f32 %v1874_v15, %v743_v22 }
 0x107   :  { %v617_v27 = vpop.f32.mrf.mxu0  ;;  %v745_v28 = vpop.f32.mrf.mxu1 }
 0x108   :  { %1170 = vst.msk [vmem:[%s2199_s3 + $0x18] sm:$0xf] %vm1163_vm3, %v1409_v23  ;;  %1202 = vst.msk [vmem:[%s2199_s3 + $0x98] sm:$0xf] %vm1163_vm3, %v1441_v24  ;;  %v850_v29 = vmax.f32 %v616_v25, 0.0  ;;  %v882_v30 = vmax.f32 %v744_v26, 0.0 }
 0x109   :  { %v620_v31 = vpop.f32.mrf.mxu0  ;;  %v748_v32 = vpop.f32.mrf.mxu1 }
 0x10a   :  { %v1410_v33 = vpack.c.bf16 %v850_v29, %v850_v29  ;;  %v1442_v34 = vpack.c.bf16 %v882_v30, %v882_v30  ;;  %v621_v35 = vadd.f32 %v1874_v15, %v620_v31  ;;  %v749_v36 = vadd.f32 %v1874_v15, %v748_v32 }
 0x10b   :  { %v622_v37 = vpop.f32.mrf.mxu0  ;;  %v750_v38 = vpop.f32.mrf.mxu1 }
 0x10c   :  { %1171 = vst.msk [vmem:[%s2199_s3 + $0x1c] sm:$0xf] %vm1163_vm3, %v1410_v33  ;;  %1203 = vst.msk [vmem:[%s2199_s3 + $0x9c] sm:$0xf] %vm1163_vm3, %v1442_v34  ;;  %v851_v39 = vmax.f32 %v621_v35, 0.0  ;;  %v883_v40 = vmax.f32 %v749_v36, 0.0 }
 0x10d   :  { %v623_v41 = vpop.f32.mrf.mxu0  ;;  %v751_v42 = vpop.f32.mrf.mxu1 }
 0x10e   :  { %v1411_v43 = vpack.c.bf16 %v851_v39, %v851_v39  ;;  %v1443_v44 = vpack.c.bf16 %v883_v40, %v883_v40  ;;  %v624_v45 = vadd.f32 %v1874_v15, %v623_v41  ;;  %v752_v46 = vadd.f32 %v1874_v15, %v751_v42 }
 0x10f   :  { %v625_v47 = vpop.f32.mrf.mxu0  ;;  %v753_v48 = vpop.f32.mrf.mxu1 }
 0x110   :  { %1172 = vst.msk [vmem:[%s2199_s3 + $0x20] sm:$0xf] %vm1163_vm3, %v1411_v43  ;;  %1204 = vst.msk [vmem:[%s2199_s3 + $0xa0] sm:$0xf] %vm1163_vm3, %v1443_v44  ;;  %v852_v49 = vmax.f32 %v624_v45, 0.0  ;;  %v884_v50 = vmax.f32 %v752_v46, 0.0 }
 0x111   :  { %v628_v51 = vpop.f32.mrf.mxu0  ;;  %v756_v52 = vpop.f32.mrf.mxu1 }
 0x112   :  { %v1412_v53 = vpack.c.bf16 %v852_v49, %v852_v49  ;;  %v1444_v54 = vpack.c.bf16 %v884_v50, %v884_v50  ;;  %v629_v55 = vadd.f32 %v1874_v15, %v628_v51  ;;  %v757_v56 = vadd.f32 %v1874_v15, %v756_v52 }
 0x113   :  { %v630_v57 = vpop.f32.mrf.mxu0  ;;  %v758_v58 = vpop.f32.mrf.mxu1 }
 0x114   :  { %1173 = vst.msk [vmem:[%s2199_s3 + $0x24] sm:$0xf] %vm1163_vm3, %v1412_v53  ;;  %1205 = vst.msk [vmem:[%s2199_s3 + $0xa4] sm:$0xf] %vm1163_vm3, %v1444_v54  ;;  %v853_v59 = vmax.f32 %v629_v55, 0.0  ;;  %v885_v60 = vmax.f32 %v757_v56, 0.0 }
 0x115   :  { %v631_v61 = vpop.f32.mrf.mxu0  ;;  %v759_v62 = vpop.f32.mrf.mxu1 }
 0x116   :  { %v1413_v63 = vpack.c.bf16 %v853_v59, %v853_v59  ;;  %v1445_v0 = vpack.c.bf16 %v885_v60, %v885_v60  ;;  %v632_v1 = vadd.f32 %v1874_v15, %v631_v61  ;;  %v760_v2 = vadd.f32 %v1874_v15, %v759_v62 }
 0x117   :  { %v633_v3 = vpop.f32.mrf.mxu0  ;;  %v761_v4 = vpop.f32.mrf.mxu1 }
 0x118   :  { %1174 = vst.msk [vmem:[%s2199_s3 + $0x28] sm:$0xf] %vm1163_vm3, %v1413_v63  ;;  %1206 = vst.msk [vmem:[%s2199_s3 + $0xa8] sm:$0xf] %vm1163_vm3, %v1445_v0  ;;  %v854_v5 = vmax.f32 %v632_v1, 0.0  ;;  %v886_v6 = vmax.f32 %v760_v2, 0.0 }
 0x119   :  { %v636_v7 = vpop.f32.mrf.mxu0  ;;  %v764_v8 = vpop.f32.mrf.mxu1 }
 0x11a   :  { %v1414_v9 = vpack.c.bf16 %v854_v5, %v854_v5  ;;  %v1446_v10 = vpack.c.bf16 %v886_v6, %v886_v6  ;;  %v637_v11 = vadd.f32 %v1874_v15, %v636_v7  ;;  %v765_v12 = vadd.f32 %v1874_v15, %v764_v8 }
 0x11b   :  { %v638_v13 = vpop.f32.mrf.mxu0  ;;  %v766_v14 = vpop.f32.mrf.mxu1 }
 0x11c   :  { %1175 = vst.msk [vmem:[%s2199_s3 + $0x2c] sm:$0xf] %vm1163_vm3, %v1414_v9  ;;  %1207 = vst.msk [vmem:[%s2199_s3 + $0xac] sm:$0xf] %vm1163_vm3, %v1446_v10  ;;  %v855_v16 = vmax.f32 %v637_v11, 0.0  ;;  %v887_v17 = vmax.f32 %v765_v12, 0.0 }
 0x11d   :  { %v639_v18 = vpop.f32.mrf.mxu0  ;;  %v767_v19 = vpop.f32.mrf.mxu1 }
 0x11e   :  { %v1415_v20 = vpack.c.bf16 %v855_v16, %v855_v16  ;;  %v1447_v21 = vpack.c.bf16 %v887_v17, %v887_v17  ;;  %v640_v22 = vadd.f32 %v1874_v15, %v639_v18  ;;  %v768_v23 = vadd.f32 %v1874_v15, %v767_v19 }
 0x11f   :  { %v641_v24 = vpop.f32.mrf.mxu0  ;;  %v769_v25 = vpop.f32.mrf.mxu1 }
 0x120   :  { %1176 = vst.msk [vmem:[%s2199_s3 + $0x30] sm:$0xf] %vm1163_vm3, %v1415_v20  ;;  %1208 = vst.msk [vmem:[%s2199_s3 + $0xb0] sm:$0xf] %vm1163_vm3, %v1447_v21  ;;  %v856_v26 = vmax.f32 %v640_v22, 0.0  ;;  %v888_v27 = vmax.f32 %v768_v23, 0.0 }
 0x121   :  { %v644_v28 = vpop.f32.mrf.mxu0  ;;  %v772_v29 = vpop.f32.mrf.mxu1 }
 0x122   :  { %v1416_v30 = vpack.c.bf16 %v856_v26, %v856_v26  ;;  %v1448_v31 = vpack.c.bf16 %v888_v27, %v888_v27  ;;  %v645_v32 = vadd.f32 %v1874_v15, %v644_v28  ;;  %v773_v33 = vadd.f32 %v1874_v15, %v772_v29 }
 0x123   :  { %v646_v34 = vpop.f32.mrf.mxu0  ;;  %v774_v35 = vpop.f32.mrf.mxu1 }
 0x124   :  { %1177 = vst.msk [vmem:[%s2199_s3 + $0x34] sm:$0xf] %vm1163_vm3, %v1416_v30  ;;  %1209 = vst.msk [vmem:[%s2199_s3 + $0xb4] sm:$0xf] %vm1163_vm3, %v1448_v31  ;;  %v857_v36 = vmax.f32 %v645_v32, 0.0  ;;  %v889_v37 = vmax.f32 %v773_v33, 0.0 }
 0x125   :  { %v647_v38 = vpop.f32.mrf.mxu0  ;;  %v775_v39 = vpop.f32.mrf.mxu1 }
 0x126   :  { %v1417_v40 = vpack.c.bf16 %v857_v36, %v857_v36  ;;  %v1449_v41 = vpack.c.bf16 %v889_v37, %v889_v37  ;;  %v648_v42 = vadd.f32 %v1874_v15, %v647_v38  ;;  %v776_v43 = vadd.f32 %v1874_v15, %v775_v39 }
 0x127   :  { %v649_v44 = vpop.f32.mrf.mxu0  ;;  %v777_v45 = vpop.f32.mrf.mxu1 }
 0x128   :  { %1178 = vst.msk [vmem:[%s2199_s3 + $0x38] sm:$0xf] %vm1163_vm3, %v1417_v40  ;;  %1210 = vst.msk [vmem:[%s2199_s3 + $0xb8] sm:$0xf] %vm1163_vm3, %v1449_v41  ;;  %v858_v46 = vmax.f32 %v648_v42, 0.0  ;;  %v890_v47 = vmax.f32 %v776_v43, 0.0 }
 0x129   :  { %v652_v48 = vpop.f32.mrf.mxu0  ;;  %v780_v49 = vpop.f32.mrf.mxu1 }
 0x12a   :  { %v1418_v50 = vpack.c.bf16 %v858_v46, %v858_v46  ;;  %v1450_v51 = vpack.c.bf16 %v890_v47, %v890_v47  ;;  %v653_v52 = vadd.f32 %v1874_v15, %v652_v48  ;;  %v781_v53 = vadd.f32 %v1874_v15, %v780_v49 }
 0x12b   :  { %v654_v54 = vpop.f32.mrf.mxu0  ;;  %v782_v55 = vpop.f32.mrf.mxu1 }
 0x12c   :  { %1179 = vst.msk [vmem:[%s2199_s3 + $0x3c] sm:$0xf] %vm1163_vm3, %v1418_v50  ;;  %1211 = vst.msk [vmem:[%s2199_s3 + $0xbc] sm:$0xf] %vm1163_vm3, %v1450_v51  ;;  %v859_v56 = vmax.f32 %v653_v52, 0.0  ;;  %v891_v57 = vmax.f32 %v781_v53, 0.0 }
 0x12d   :  { %v655_v58 = vpop.f32.mrf.mxu0  ;;  %v783_v59 = vpop.f32.mrf.mxu1 }
 0x12e   :  { %v1419_v60 = vpack.c.bf16 %v859_v56, %v859_v56  ;;  %v1451_v61 = vpack.c.bf16 %v891_v57, %v891_v57  ;;  %v656_v62 = vadd.f32 %v1874_v15, %v655_v58  ;;  %v784_v63 = vadd.f32 %v1874_v15, %v783_v59 }
 0x12f   :  { %v657_v0 = vpop.f32.mrf.mxu0  ;;  %v785_v1 = vpop.f32.mrf.mxu1 }
 0x130   :  { %1180 = vst.msk [vmem:[%s2199_s3 + $0x40] sm:$0xf] %vm1163_vm3, %v1419_v60  ;;  %1212 = vst.msk [vmem:[%s2199_s3 + $0xc0] sm:$0xf] %vm1163_vm3, %v1451_v61  ;;  %v860_v2 = vmax.f32 %v656_v62, 0.0  ;;  %v892_v3 = vmax.f32 %v784_v63, 0.0 }
 0x131   :  { %v660_v4 = vpop.f32.mrf.mxu0  ;;  %v788_v5 = vpop.f32.mrf.mxu1 }
 0x132   :  { %v1420_v6 = vpack.c.bf16 %v860_v2, %v860_v2  ;;  %v1452_v7 = vpack.c.bf16 %v892_v3, %v892_v3  ;;  %v661_v8 = vadd.f32 %v1874_v15, %v660_v4  ;;  %v789_v9 = vadd.f32 %v1874_v15, %v788_v5 }
 0x133   :  { %v662_v10 = vpop.f32.mrf.mxu0  ;;  %v790_v11 = vpop.f32.mrf.mxu1 }
 0x134   :  { %1181 = vst.msk [vmem:[%s2199_s3 + $0x44] sm:$0xf] %vm1163_vm3, %v1420_v6  ;;  %1213 = vst.msk [vmem:[%s2199_s3 + $0xc4] sm:$0xf] %vm1163_vm3, %v1452_v7  ;;  %v861_v12 = vmax.f32 %v661_v8, 0.0  ;;  %v893_v13 = vmax.f32 %v789_v9, 0.0 }
 0x135   :  { %v663_v14 = vpop.f32.mrf.mxu0  ;;  %v791_v16 = vpop.f32.mrf.mxu1 }
 0x136   :  { %v1421_v17 = vpack.c.bf16 %v861_v12, %v861_v12  ;;  %v1453_v18 = vpack.c.bf16 %v893_v13, %v893_v13  ;;  %v664_v19 = vadd.f32 %v1874_v15, %v663_v14  ;;  %v792_v20 = vadd.f32 %v1874_v15, %v791_v16 }
 0x137   :  { %v665_v21 = vpop.f32.mrf.mxu0  ;;  %v793_v22 = vpop.f32.mrf.mxu1 }
 0x138   :  { %1182 = vst.msk [vmem:[%s2199_s3 + $0x48] sm:$0xf] %vm1163_vm3, %v1421_v17  ;;  %1214 = vst.msk [vmem:[%s2199_s3 + $0xc8] sm:$0xf] %vm1163_vm3, %v1453_v18  ;;  %v862_v23 = vmax.f32 %v664_v19, 0.0  ;;  %v894_v24 = vmax.f32 %v792_v20, 0.0 }
 0x139   :  { %v668_v25 = vpop.f32.mrf.mxu0  ;;  %v796_v26 = vpop.f32.mrf.mxu1 }
 0x13a   :  { %v1422_v27 = vpack.c.bf16 %v862_v23, %v862_v23  ;;  %v1454_v28 = vpack.c.bf16 %v894_v24, %v894_v24  ;;  %v669_v29 = vadd.f32 %v1874_v15, %v668_v25  ;;  %v797_v30 = vadd.f32 %v1874_v15, %v796_v26 }
 0x13b   :  { %v670_v31 = vpop.f32.mrf.mxu0  ;;  %v798_v32 = vpop.f32.mrf.mxu1 }
 0x13c   :  { %1183 = vst.msk [vmem:[%s2199_s3 + $0x4c] sm:$0xf] %vm1163_vm3, %v1422_v27  ;;  %1215 = vst.msk [vmem:[%s2199_s3 + $0xcc] sm:$0xf] %vm1163_vm3, %v1454_v28  ;;  %v863_v33 = vmax.f32 %v669_v29, 0.0  ;;  %v895_v34 = vmax.f32 %v797_v30, 0.0 }
 0x13d   :  { %v671_v35 = vpop.f32.mrf.mxu0  ;;  %v799_v36 = vpop.f32.mrf.mxu1 }
 0x13e   :  { %v1423_v37 = vpack.c.bf16 %v863_v33, %v863_v33  ;;  %v1455_v38 = vpack.c.bf16 %v895_v34, %v895_v34  ;;  %v672_v39 = vadd.f32 %v1874_v15, %v671_v35  ;;  %v800_v40 = vadd.f32 %v1874_v15, %v799_v36 }
 0x13f   :  { %v673_v41 = vpop.f32.mrf.mxu0  ;;  %v801_v42 = vpop.f32.mrf.mxu1 }
 0x140   :  { %1184 = vst.msk [vmem:[%s2199_s3 + $0x50] sm:$0xf] %vm1163_vm3, %v1423_v37  ;;  %1216 = vst.msk [vmem:[%s2199_s3 + $0xd0] sm:$0xf] %vm1163_vm3, %v1455_v38  ;;  %v864_v43 = vmax.f32 %v672_v39, 0.0  ;;  %v896_v44 = vmax.f32 %v800_v40, 0.0 }
 0x141   :  { %v676_v45 = vpop.f32.mrf.mxu0  ;;  %v804_v46 = vpop.f32.mrf.mxu1 }
 0x142   :  { %v1424_v47 = vpack.c.bf16 %v864_v43, %v864_v43  ;;  %v1456_v48 = vpack.c.bf16 %v896_v44, %v896_v44  ;;  %v677_v49 = vadd.f32 %v1874_v15, %v676_v45  ;;  %v805_v50 = vadd.f32 %v1874_v15, %v804_v46 }
 0x143   :  { %v678_v51 = vpop.f32.mrf.mxu0  ;;  %v806_v52 = vpop.f32.mrf.mxu1 }
 0x144   :  { %1185 = vst.msk [vmem:[%s2199_s3 + $0x54] sm:$0xf] %vm1163_vm3, %v1424_v47  ;;  %1217 = vst.msk [vmem:[%s2199_s3 + $0xd4] sm:$0xf] %vm1163_vm3, %v1456_v48  ;;  %v865_v53 = vmax.f32 %v677_v49, 0.0  ;;  %v897_v54 = vmax.f32 %v805_v50, 0.0 }
 0x145   :  { %v679_v55 = vpop.f32.mrf.mxu0  ;;  %v807_v56 = vpop.f32.mrf.mxu1 }
 0x146   :  { %v1425_v57 = vpack.c.bf16 %v865_v53, %v865_v53  ;;  %v1457_v58 = vpack.c.bf16 %v897_v54, %v897_v54  ;;  %v680_v59 = vadd.f32 %v1874_v15, %v679_v55  ;;  %v808_v60 = vadd.f32 %v1874_v15, %v807_v56 }
 0x147   :  { %v681_v61 = vpop.f32.mrf.mxu0  ;;  %v809_v62 = vpop.f32.mrf.mxu1 }
 0x148   :  { %1186 = vst.msk [vmem:[%s2199_s3 + $0x58] sm:$0xf] %vm1163_vm3, %v1425_v57  ;;  %1218 = vst.msk [vmem:[%s2199_s3 + $0xd8] sm:$0xf] %vm1163_vm3, %v1457_v58  ;;  %v866_v63 = vmax.f32 %v680_v59, 0.0  ;;  %v898_v0 = vmax.f32 %v808_v60, 0.0 }
 0x149   :  { %v684_v1 = vpop.f32.mrf.mxu0  ;;  %v812_v2 = vpop.f32.mrf.mxu1 }
 0x14a   :  { %v1426_v3 = vpack.c.bf16 %v866_v63, %v866_v63  ;;  %v1458_v4 = vpack.c.bf16 %v898_v0, %v898_v0  ;;  %v685_v5 = vadd.f32 %v1874_v15, %v684_v1  ;;  %v813_v6 = vadd.f32 %v1874_v15, %v812_v2 }
 0x14b   :  { %v686_v7 = vpop.f32.mrf.mxu0  ;;  %v814_v8 = vpop.f32.mrf.mxu1 }
 0x14c   :  { %1187 = vst.msk [vmem:[%s2199_s3 + $0x5c] sm:$0xf] %vm1163_vm3, %v1426_v3  ;;  %1219 = vst.msk [vmem:[%s2199_s3 + $0xdc] sm:$0xf] %vm1163_vm3, %v1458_v4  ;;  %v867_v9 = vmax.f32 %v685_v5, 0.0  ;;  %v899_v10 = vmax.f32 %v813_v6, 0.0 }
 0x14d   :  { %v687_v11 = vpop.f32.mrf.mxu0  ;;  %v815_v12 = vpop.f32.mrf.mxu1 }
 0x14e   :  { %v1427_v13 = vpack.c.bf16 %v867_v9, %v867_v9  ;;  %v1459_v14 = vpack.c.bf16 %v899_v10, %v899_v10  ;;  %v688_v16 = vadd.f32 %v1874_v15, %v687_v11  ;;  %v816_v17 = vadd.f32 %v1874_v15, %v815_v12 }
 0x14f   :  { %v689_v18 = vpop.f32.mrf.mxu0  ;;  %v817_v19 = vpop.f32.mrf.mxu1 }
 0x150   :  { %1188 = vst.msk [vmem:[%s2199_s3 + $0x60] sm:$0xf] %vm1163_vm3, %v1427_v13  ;;  %1220 = vst.msk [vmem:[%s2199_s3 + $0xe0] sm:$0xf] %vm1163_vm3, %v1459_v14  ;;  %v868_v20 = vmax.f32 %v688_v16, 0.0  ;;  %v900_v21 = vmax.f32 %v816_v17, 0.0 }
 0x151   :  { %v692_v22 = vpop.f32.mrf.mxu0  ;;  %v820_v23 = vpop.f32.mrf.mxu1 }
 0x152   :  { %v1428_v24 = vpack.c.bf16 %v868_v20, %v868_v20  ;;  %v1460_v25 = vpack.c.bf16 %v900_v21, %v900_v21  ;;  %v693_v26 = vadd.f32 %v1874_v15, %v692_v22  ;;  %v821_v27 = vadd.f32 %v1874_v15, %v820_v23 }
 0x153   :  { %v694_v28 = vpop.f32.mrf.mxu0  ;;  %v822_v29 = vpop.f32.mrf.mxu1 }
 0x154   :  { %1189 = vst.msk [vmem:[%s2199_s3 + $0x64] sm:$0xf] %vm1163_vm3, %v1428_v24  ;;  %1221 = vst.msk [vmem:[%s2199_s3 + $0xe4] sm:$0xf] %vm1163_vm3, %v1460_v25  ;;  %v869_v30 = vmax.f32 %v693_v26, 0.0  ;;  %v901_v31 = vmax.f32 %v821_v27, 0.0 }
 0x155   :  { %v695_v32 = vpop.f32.mrf.mxu0  ;;  %v823_v33 = vpop.f32.mrf.mxu1 }
 0x156   :  { %v1429_v34 = vpack.c.bf16 %v869_v30, %v869_v30  ;;  %v1461_v35 = vpack.c.bf16 %v901_v31, %v901_v31  ;;  %v696_v36 = vadd.f32 %v1874_v15, %v695_v32  ;;  %v824_v37 = vadd.f32 %v1874_v15, %v823_v33 }
 0x157   :  { %v697_v38 = vpop.f32.mrf.mxu0  ;;  %v825_v39 = vpop.f32.mrf.mxu1 }
 0x158   :  { %1190 = vst.msk [vmem:[%s2199_s3 + $0x68] sm:$0xf] %vm1163_vm3, %v1429_v34  ;;  %1222 = vst.msk [vmem:[%s2199_s3 + $0xe8] sm:$0xf] %vm1163_vm3, %v1461_v35  ;;  %v870_v40 = vmax.f32 %v696_v36, 0.0  ;;  %v902_v41 = vmax.f32 %v824_v37, 0.0 }
 0x159   :  { %v700_v42 = vpop.f32.mrf.mxu0  ;;  %v828_v43 = vpop.f32.mrf.mxu1 }
 0x15a   :  { %v1430_v44 = vpack.c.bf16 %v870_v40, %v870_v40  ;;  %v1462_v45 = vpack.c.bf16 %v902_v41, %v902_v41  ;;  %v701_v46 = vadd.f32 %v1874_v15, %v700_v42  ;;  %v829_v47 = vadd.f32 %v1874_v15, %v828_v43 }
 0x15b   :  { %v702_v48 = vpop.f32.mrf.mxu0  ;;  %v830_v49 = vpop.f32.mrf.mxu1 }
 0x15c   :  { %1191 = vst.msk [vmem:[%s2199_s3 + $0x6c] sm:$0xf] %vm1163_vm3, %v1430_v44  ;;  %1223 = vst.msk [vmem:[%s2199_s3 + $0xec] sm:$0xf] %vm1163_vm3, %v1462_v45  ;;  %v871_v50 = vmax.f32 %v701_v46, 0.0  ;;  %v903_v51 = vmax.f32 %v829_v47, 0.0 }
 0x15d   :  { %v703_v52 = vpop.f32.mrf.mxu0  ;;  %v831_v53 = vpop.f32.mrf.mxu1 }
 0x15e   :  { %v1431_v54 = vpack.c.bf16 %v871_v50, %v871_v50  ;;  %v1463_v55 = vpack.c.bf16 %v903_v51, %v903_v51  ;;  %v704_v56 = vadd.f32 %v1874_v15, %v703_v52  ;;  %v832_v57 = vadd.f32 %v1874_v15, %v831_v53 }
 0x15f   :  { %v705_v58 = vpop.f32.mrf.mxu0  ;;  %v833_v59 = vpop.f32.mrf.mxu1 }
 0x160   :  { %1192 = vst.msk [vmem:[%s2199_s3 + $0x70] sm:$0xf] %vm1163_vm3, %v1431_v54  ;;  %1224 = vst.msk [vmem:[%s2199_s3 + $0xf0] sm:$0xf] %vm1163_vm3, %v1463_v55  ;;  %v872_v60 = vmax.f32 %v704_v56, 0.0  ;;  %v904_v61 = vmax.f32 %v832_v57, 0.0 }
 0x161   :  { %v708_v62 = vpop.f32.mrf.mxu0  ;;  %v836_v63 = vpop.f32.mrf.mxu1 }
 0x162   :  { %v1432_v0 = vpack.c.bf16 %v872_v60, %v872_v60  ;;  %v1464_v1 = vpack.c.bf16 %v904_v61, %v904_v61  ;;  %v709_v2 = vadd.f32 %v1874_v15, %v708_v62  ;;  %v837_v3 = vadd.f32 %v1874_v15, %v836_v63 }
 0x163   :  { %v710_v4 = vpop.f32.mrf.mxu0  ;;  %v838_v5 = vpop.f32.mrf.mxu1 }
 0x164   :  { %1193 = vst.msk [vmem:[%s2199_s3 + $0x74] sm:$0xf] %vm1163_vm3, %v1432_v0  ;;  %1225 = vst.msk [vmem:[%s2199_s3 + $0xf4] sm:$0xf] %vm1163_vm3, %v1464_v1  ;;  %v873_v6 = vmax.f32 %v709_v2, 0.0  ;;  %v905_v7 = vmax.f32 %v837_v3, 0.0 }
 0x165   :  { %v711_v8 = vpop.f32.mrf.mxu0  ;;  %v839_v9 = vpop.f32.mrf.mxu1 }
 0x166   :  { %v1433_v10 = vpack.c.bf16 %v873_v6, %v873_v6  ;;  %v1465_v11 = vpack.c.bf16 %v905_v7, %v905_v7  ;;  %v712_v12 = vadd.f32 %v1874_v15, %v711_v8  ;;  %v840_v13 = vadd.f32 %v1874_v15, %v839_v9 }
 0x167   :  { %v713_v14 = vpop.f32.mrf.mxu0  ;;  %v841_v16 = vpop.f32.mrf.mxu1 }
 0x168   :  { %1194 = vst.msk [vmem:[%s2199_s3 + $0x78] sm:$0xf] %vm1163_vm3, %v1433_v10  ;;  %1226 = vst.msk [vmem:[%s2199_s3 + $0xf8] sm:$0xf] %vm1163_vm3, %v1465_v11  ;;  %v874_v17 = vmax.f32 %v712_v12, 0.0  ;;  %v906_v18 = vmax.f32 %v840_v13, 0.0 }
 0x16a   :  { %v1434_v19 = vpack.c.bf16 %v874_v17, %v874_v17  ;;  %v1466_v20 = vpack.c.bf16 %v906_v18, %v906_v18 }
 0x16c   :  { %1195 = vst.msk [vmem:[%s2199_s3 + $0x7c] sm:$0xf] %vm1163_vm3, %v1434_v19  ;;  %1227 = vst.msk [vmem:[%s2199_s3 + $0xfc] sm:$0xf] %vm1163_vm3, %v1466_v20 }

</bundles_post_ra>
